<compile_context>
chip_gen: v6e
topology: v6e:2x2x1
jax: 0.10.0
libtpu: 0.0.40
codegen_flags: <defaults>
</compile_context>

<pallas_src>
import jax
import jax.numpy as jnp
from jax.experimental import pallas as pl
from jax.experimental.pallas import tpu as pltpu


def fixednorm2d_kernel(x_ref, scale_ref, bias_ref, o_ref):
    # x_ref: (Tr, Tc) tile; scale_ref / bias_ref: (Tr, 1) per-row parameters.
    # One VPU multiply-add per vreg, broadcast along the lane dimension.
    o_ref[...] = x_ref[...] * scale_ref[...] + bias_ref[...]


def _pick_tile(total, unit, max_elems):
    """Largest t <= max_elems with t % unit == 0 and total % t == 0.

    Falls back to `total` (full extent) when it already fits or when no such
    divisor exists — full-extent blocks are always layout-legal on TPU.
    """
    if total <= max_elems:
        return total
    best = None
    t = unit
    limit = min(total, max_elems)
    while t <= limit:
        if total % t == 0:
            best = t
        t += unit
    return best if best is not None else total


def fixed_norm_2d(x, m, v, *, target_block_bytes=1 << 20):
    """Pallas implementation of FixedNorm2d.forward.

    x: (N, C, H, W)  input
    m: (C,)          fixed per-channel mean
    v: (C,)          fixed per-channel variance (std = sqrt(v))

    Computes (x - m) / (sqrt(v) + 1e-5), rewritten as x * scale + bias with
    scale = 1/(sqrt(v)+1e-5) and bias = -m*scale precomputed per channel.
    """
    N, C, H, W = x.shape
    R, HW = N * C, H * W
    dsize = jnp.dtype(x.dtype).itemsize

    # Fold the fixed statistics into a per-channel scale/bias (f32 math),
    # replicated per row of the flattened (N*C, H*W) view.
    scale_c = 1.0 / (jnp.sqrt(v.astype(jnp.float32)) + 1e-5)
    bias_c = -m.astype(jnp.float32) * scale_c
    scale_rows = jnp.tile(scale_c, N).reshape(R, 1).astype(x.dtype)
    bias_rows = jnp.tile(bias_c, N).reshape(R, 1).astype(x.dtype)

    x2 = x.reshape(R, HW)

    # Tile sizes: lane dim first (multiple of 128 or full extent), then rows
    # (multiple of 8 or full extent), targeting ~1 MiB input blocks.
    tcol = _pick_tile(HW, 128, max(128, target_block_bytes // (8 * dsize)))
    trow = _pick_tile(R, 8, max(8, target_block_bytes // (tcol * dsize)))
    grid = (R // trow, HW // tcol)

    # Only raise the scoped-VMEM limit if the (rare) full-extent fallback made
    # the blocks bigger than the smallest default (v5e: 16 MiB).
    block_bytes = trow * tcol * dsize
    est_vmem = 4 * block_bytes + 4 * trow * 128 * dsize + (1 << 20)
    vmem_limit = None if est_vmem <= (16 << 20) else min(est_vmem, 64 << 20)

    total = N * C * H * W
    cost = pl.CostEstimate(
        flops=2 * total, transcendentals=0, bytes_accessed=2 * total * dsize
    )

    out2 = pl.pallas_call(
        fixednorm2d_kernel,
        out_shape=jax.ShapeDtypeStruct((R, HW), x.dtype),
        grid_spec=pltpu.PrefetchScalarGridSpec(
            num_scalar_prefetch=0,
            grid=grid,
            in_specs=[
                pl.BlockSpec((trow, tcol), lambda i, j: (i, j)),
                # Per-row scale/bias: block index constant along the inner
                # (column) axis, so the DMA is skipped on repeated j.
                pl.BlockSpec((trow, 1), lambda i, j: (i, 0)),
                pl.BlockSpec((trow, 1), lambda i, j: (i, 0)),
            ],
            out_specs=pl.BlockSpec((trow, tcol), lambda i, j: (i, j)),
        ),
        compiler_params=pltpu.CompilerParams(
            dimension_semantics=("parallel", "parallel"),
            vmem_limit_bytes=vmem_limit,
        ),
        cost_estimate=cost,
    )(x2, scale_rows, bias_rows)

    return out2.reshape(N, C, H, W)


if __name__ == "__main__":
    key = jax.random.PRNGKey(0)
    kx, km, kv = jax.random.split(key, 3)

    N, C, H, W = 2, 4, 16, 16
    x = jax.random.normal(kx, (N, C, H, W), dtype=jnp.float32)
    # Deterministic "fixed" stats (FixedNorm2d.set_mean_var would provide these).
    m = jax.random.normal(km, (C,), dtype=jnp.float32)
    v = jax.random.uniform(kv, (C,), dtype=jnp.float32, minval=0.5, maxval=2.0)

    out = fixed_norm_2d(x, m, v)
    out = jax.block_until_ready(out)

    # Reference check (matches PyTorch FixedNorm2d.forward semantics).
    ref = (x - m.reshape(1, C, 1, 1)) / (jnp.sqrt(v).reshape(1, C, 1, 1) + 1e-5)
    # x*scale + bias differs from (x - m)/std by ~1 ulp of the folded reciprocal.
    assert jnp.allclose(out, ref, atol=1e-5, rtol=1e-5), "mismatch vs reference"

    print("KERNEL_OK")
</pallas_src>

<mosaic_0001>
module attributes {stable_mosaic.version = 11 : i64} {
  func.func @fixednorm2d_kernel(%arg0: i32, %arg1: i32, %arg2: memref<8x256xf32, #tpu.memory_space<vmem>>, %arg3: memref<8x1xf32, #tpu.memory_space<vmem>>, %arg4: memref<8x1xf32, #tpu.memory_space<vmem>>, %arg5: memref<8x256xf32, #tpu.memory_space<vmem>>) attributes {dimension_semantics = [#tpu.dimension_semantics<parallel>, #tpu.dimension_semantics<parallel>], iteration_bounds = array<i64: 1, 1>, scalar_prefetch = 0 : i64, scratch_operands = 0 : i64, tpu.core_type = #tpu.core_type<tc>, window_params = [{transform_indices = @transform_0, window_bounds = array<i64: 8, 256>}, {transform_indices = @transform_1, window_bounds = array<i64: 8, 1>}, {transform_indices = @transform_2, window_bounds = array<i64: 8, 1>}, {transform_indices = @transform_3, window_bounds = array<i64: 8, 256>}]} {
    %c0 = arith.constant 0 : index
    %c0_0 = arith.constant 0 : index
    %0 = vector.load %arg2[%c0, %c0_0] : memref<8x256xf32, #tpu.memory_space<vmem>>, vector<8x256xf32>
    %c0_1 = arith.constant 0 : index
    %c0_2 = arith.constant 0 : index
    %1 = vector.load %arg3[%c0_1, %c0_2] : memref<8x1xf32, #tpu.memory_space<vmem>>, vector<8x1xf32>
    %2 = vector.broadcast %1 : vector<8x1xf32> to vector<8x256xf32>
    %3 = arith.mulf %0, %2 : vector<8x256xf32>
    %c0_3 = arith.constant 0 : index
    %c0_4 = arith.constant 0 : index
    %4 = vector.load %arg4[%c0_3, %c0_4] : memref<8x1xf32, #tpu.memory_space<vmem>>, vector<8x1xf32>
    %5 = vector.broadcast %4 : vector<8x1xf32> to vector<8x256xf32>
    %6 = arith.addf %3, %5 : vector<8x256xf32>
    %c0_5 = arith.constant 0 : index
    %c0_6 = arith.constant 0 : index
    %7 = vector.load %arg5[%c0_5, %c0_6] : memref<8x256xf32, #tpu.memory_space<vmem>>, vector<8x256xf32>
    tpu.vector_store %arg5[%c0_5, %c0_6], %6 {strides = array<i32>} : memref<8x256xf32, #tpu.memory_space<vmem>>, vector<8x256xf32>,
    return
  }
  func.func @transform_0(%arg0: i32, %arg1: i32) -> (i32, i32) {
    %c0_i32 = arith.constant 0 : i32
    return %arg0, %arg1 : i32, i32
  }
  func.func @transform_1(%arg0: i32, %arg1: i32) -> (i32, i32) {
    %c0_i32 = arith.constant 0 : i32
    %c0_i32_0 = arith.constant 0 : i32
    return %arg0, %c0_i32 : i32, i32
  }
  func.func @transform_2(%arg0: i32, %arg1: i32) -> (i32, i32) {
    %c0_i32 = arith.constant 0 : i32
    %c0_i32_0 = arith.constant 0 : i32
    return %arg0, %c0_i32 : i32, i32
  }
  func.func @transform_3(%arg0: i32, %arg1: i32) -> (i32, i32) {
    %c0_i32 = arith.constant 0 : i32
    return %arg0, %arg1 : i32, i32
  }
}

</mosaic_0001>

<bundles_post_ra>
// kernel: tpu_custom_call.1
= control target key start
LH: loop header
LB: loop body
LE: loop exit
PB: predicated region body
PF: predicated region fallthrough
CT: control target
= control target key end

     0   :  { %v74_v1 = vmov 0   ;;  %s111_s0 = inlined_call_operand.vmem [shape: f32[8,256], index: 0, kind: input, shape index: {}]   ;;  %s112_s1 = inlined_call_operand.vmem [shape: f32[8,1], index: 1, kind: input, shape index: {}]   ;;  %s113_s2 = inlined_call_operand.vmem [shape: f32[8,1], index: 2, kind: input, shape index: {}]   ;;  %s114_s3 = inlined_call_operand.hbm [shape: f32[8,256], index: 3, kind: output, shape index: {}]  }
   0x1   :  { %v17_v0 = vld [vmem:[%s112_s1] sm:$0xff]  ;;  %51 = vset.pattern.permute.xlu0 %v74_v1 }
   0x2   :  { %8 = vsyncpa [#allocation3], 0  ;;  %20 = vperm.xlu0 %51, %v17_v0   ;;  %v25_v2 = vld [vmem:[%s113_s2] sm:$0xff]  ;;  %v16_v5 = vld [vmem:[%s111_s0 + $0x8] sm:$0xff]  ;;  %s75_s20 = smov [#allocation2]  }
   0x3   :  { %v15_v4 = vld [vmem:[%s111_s0] sm:$0xff]  ;;  %s41_s1 = sshll.u32 %s75_s20, 4  ;;  %s42_s1 = int_to_ptr.vmem [resolvable:$true] %s41_s1 }
   0x4   :  { %s52_s2 = scalar_lea.vmem %s42_s1, 256  ;;  %p57_p1 = scmp.lt.s32.totalorder %s42_s1, %s42_s1 }
   0x5   :  { %p53_p0 = scmp.ne.s32.totalorder %s42_s1, %s52_s2  ;;  %p58_p2 = scmp.lt.s32.totalorder %s52_s2, %s52_s2 }
   0x6   :  { %28 = vperm.xlu0 %51, %v25_v2  }
   0x7   :  { %p59_p3 = por %p58_p2, %p57_p1 }
   0x9   :  { %p60_p4 = pnand %p59_p3, %p53_p0 }
  0x7d   :  { %v21_v3 = vpop.permute.xlu0 %20 }
  0x7e   :  { %v23_v6 = vmul.f32 %v21_v3, %v15_v4  ;;  %v24_v7 = vmul.f32 %v21_v3, %v16_v5 }
  0x81   :  { %v29_v8 = vpop.permute.xlu0 %28 }
  0x82   :  { %v31_v9 = vadd.f32 %v29_v8, %v23_v6  ;;  %v32_v10 = vadd.f32 %v29_v8, %v24_v7 }
  0x84   :  { %33 = vst [vmem:[#allocation2] sm:$0xff] %v31_v9  ;;  %34 = vst [vmem:[#allocation2 + $0x8] sm:$0xff] %v32_v10 }
  0x85   :  { %63 = shalt.err (!%p60_p4)
}
  0x86   :  { %44 = dma.vmem_to_hbm [thread:$0]  %s42_s1, 256, %s114_s3, [#allocation3]  }
  0x87   :  { %72 = dma.done.wait [#allocation3], 256  }
  0x88   :  { %73 = vsyncadd [#allocation3], 4294967040 }
  0x89   :  { %48 = vsyncpa [#allocation3], 1 }

</bundles_post_ra>
